<compile_context>
chip_gen: v6e
topology: v6e:2x2x1
jax: 0.10.0
libtpu: 0.0.40
codegen_flags: <defaults>
</compile_context>

<pallas_src>
import functools
import math

import jax
import jax.numpy as jnp
import numpy as np
from jax import lax
from jax.experimental import pallas as pl
from jax.experimental.pallas import tpu as pltpu


# ----------------------------- helpers ---------------------------------------

def kernel_size_from_neighbors(k_neighbors: int) -> int:
    ks = int(math.sqrt(k_neighbors))
    if ks == 8:
        return 7
    if ks == 4:
        return 5
    if ks == 2:
        return 3
    raise ValueError(f"Invalid kernel size: {ks}")


def _pick_m_tile(m: int, cap: int = 1024) -> int:
    """Largest divisor of m that is <= cap and a multiple of 8 (or m itself)."""
    if m <= cap:
        return m
    for tm in range(cap, 7, -1):
        if m % tm == 0 and tm % 8 == 0:
            return tm
    return m  # TODO(synk): pad + mask ragged M instead of one huge tile.


def _pick_row_tile(H: int, W: int, K: int, budget_bytes: int = 2 << 20) -> int:
    """Largest row-tile th dividing H whose f32 score block fits the budget."""
    cands = [t for t in range(1, H + 1)
             if H % t == 0 and ((t * W) % 8 == 0 or t == H)]
    for t in sorted(cands, reverse=True):
        band = min(t + K - 1, H) * W
        if t * W * band * 4 <= budget_bytes:
            return t
    return min(cands)


# ----------------------------- fused qkv projection ---------------------------

def _qkv_kernel(x_ref, wq_ref, wk_ref, wv_ref, bq_ref, bk_ref, bv_ref,
                q_ref, k_ref, v_ref, *, scale):
    x = x_ref[...].astype(jnp.bfloat16)   # bf16 MXU operand, f32 accumulation

    def proj(w_ref, b_ref):
        y = lax.dot_general(x, w_ref[...], (((1,), (1,)), ((), ())),
                            preferred_element_type=jnp.float32)
        return y + b_ref[...]

    # Softmax scale folded into q here (matches module: q = q * scale).
    q_ref[...] = (proj(wq_ref, bq_ref) * scale).astype(q_ref.dtype)
    k_ref[...] = proj(wk_ref, bk_ref).astype(k_ref.dtype)
    v_ref[...] = proj(wv_ref, bv_ref).astype(v_ref.dtype)


def qkv_projection(x2d, wq, wk, wv, bq, bk, bv, *, scale):
    """x2d: (M, C) f32.  Returns (q_scaled, k, v), each (M, C) bf16."""
    m, cin = x2d.shape
    cq = wq.shape[0]
    tm = _pick_m_tile(m)
    assert m % tm == 0
    kern = functools.partial(_qkv_kernel, scale=scale)
    out_sds = jax.ShapeDtypeStruct((m, cq), jnp.bfloat16)
    w_spec = pl.BlockSpec((cq, cin), lambda i: (0, 0))
    b_spec = pl.BlockSpec((1, cq), lambda i: (0, 0))
    o_spec = pl.BlockSpec((tm, cq), lambda i: (i, 0))
    return pl.pallas_call(
        kern,
        out_shape=(out_sds, out_sds, out_sds),
        grid=(m // tm,),
        in_specs=[pl.BlockSpec((tm, cin), lambda i: (i, 0)),
                  w_spec, w_spec, w_spec, b_spec, b_spec, b_spec],
        out_specs=(o_spec, o_spec, o_spec),
        compiler_params=pltpu.CompilerParams(dimension_semantics=("parallel",)),
    )(x2d, wq, wk, wv,
      bq.reshape(1, cq), bk.reshape(1, cq), bv.reshape(1, cq))


# ----------------------------- banded neighborhood attention + proj -----------

def _na_kernel(q_ref, k_ref, v_ref, pw_ref, pb_ref, o_ref, acc_ref, *,
               num_heads, head_dim, H, W, K, th, band_rows):
    nb = K // 2
    tqe = th * W              # query elements in this row tile
    band = band_rows * W      # key/value elements visible to this tile
    i = pl.program_id(1)

    # Band start row (scalar int arithmetic; NATTEN get_window_start, dilation=1).
    rs = jnp.clip(i * th - nb, 0, H - band_rows)
    start = pl.multiple_of(rs * W, W)

    # Banded neighborhood mask; div/mod only on O(tqe + band) elements, the
    # (tqe, band) bool comes from broadcasting compares (pure VPU, no HBM).
    qf = lax.broadcasted_iota(jnp.int32, (tqe, 1), 0)
    kf = lax.broadcasted_iota(jnp.int32, (1, band), 1)
    qr = i * th + qf // W
    qc = qf % W
    kr = rs + kf // W
    kc = kf % W
    sr = jnp.clip(qr - nb, 0, H - K)
    sc = jnp.clip(qc - nb, 0, W - K)
    mask = (kr >= sr) & (kr < sr + K) & (kc >= sc) & (kc < sc + K)  # (tqe, band)

    q = q_ref[...]                          # (tqe, C) bf16, already scaled
    kb = k_ref[pl.ds(start, band), :]       # (band, C) bf16 key band
    vb = v_ref[pl.ds(start, band), :]       # (band, C) bf16 value band

    # Per-head attention (head_dim is tiny -> attention core is VPU/EUP bound;
    # keep the MXU work in the fused projection below).
    for h in range(num_heads):              # static unroll
        lo = h * head_dim
        hi = lo + head_dim
        s = lax.dot_general(q[:, lo:hi], kb[:, lo:hi],
                            (((1,), (1,)), ((), ())),
                            preferred_element_type=jnp.float32)     # (tqe, band)
        s = jnp.where(mask, s, -1e30)
        m = jnp.max(s, axis=-1, keepdims=True)
        p = jnp.exp(s - m)
        denom = jnp.sum(p, axis=-1, keepdims=True)
        o = lax.dot_general(p.astype(jnp.bfloat16), vb[:, lo:hi],
                            (((1,), (0,)), ((), ())),
                            preferred_element_type=jnp.float32)     # (tqe, hd)
        # Write each head straight into the slab; no concatenate, bounded live ranges.
        acc_ref[:, lo:hi] = (o * pl.reciprocal(denom, approx=True)
                             ).astype(acc_ref.dtype)

    # Fused output projection: one lane-dense (tqe, C) store, no f32 HBM
    # intermediate between attention and proj.
    y = lax.dot_general(acc_ref[...], pw_ref[...],
                        (((1,), (1,)), ((), ())),
                        preferred_element_type=jnp.float32)
    o_ref[...] = (y + pb_ref[...]).astype(o_ref.dtype)


def na_attention_proj(q, k, v, proj_w, proj_b, *, num_heads, head_dim, H, W,
                      kernel_size, row_tile=None):
    """q/k/v: (B, L, C) bf16 (q pre-scaled).  Returns proj output (B, L, C) f32."""
    B, L, C = q.shape
    K = kernel_size
    th = row_tile if row_tile is not None else _pick_row_tile(H, W, K)
    assert H % th == 0, "row tile must divide H"
    band_rows = min(th + K - 1, H)
    tqe = th * W
    n_tiles = H // th

    kern = functools.partial(
        _na_kernel, num_heads=num_heads, head_dim=head_dim,
        H=H, W=W, K=K, th=th, band_rows=band_rows)

    return pl.pallas_call(
        kern,
        out_shape=jax.ShapeDtypeStruct((B, L, C), jnp.float32),
        grid=(B, n_tiles),
        in_specs=[
            pl.BlockSpec((None, tqe, C), lambda b, i: (b, i, 0)),  # q row tile
            pl.BlockSpec((None, L, C), lambda b, i: (b, 0, 0)),    # K resident/batch
            pl.BlockSpec((None, L, C), lambda b, i: (b, 0, 0)),    # V resident/batch
            pl.BlockSpec((C, C), lambda b, i: (0, 0)),             # proj weight
            pl.BlockSpec((1, C), lambda b, i: (0, 0)),             # proj bias
        ],
        out_specs=pl.BlockSpec((None, tqe, C), lambda b, i: (b, i, 0)),
        scratch_shapes=[pltpu.VMEM((tqe, C), jnp.bfloat16)],
        compiler_params=pltpu.CompilerParams(
            dimension_semantics=("parallel", "parallel")),  # 2-D split across v7x's 2 TCs
    )(q, k, v, proj_w, proj_b.reshape(1, C))


# ----------------------------- forward pass -----------------------------------

def neighborhood_attention_2d(x, params, num_heads: int, k_neighbors: int,
                              row_tile=None):
    """Pallas forward matching NeighborhoodAttention2D.forward (non-fused path)."""
    B, L, C = x.shape
    Hs = int(round(math.sqrt(L)))
    Ws = Hs
    assert Hs * Ws == L, "module assumes a square HxW feature map"
    K = kernel_size_from_neighbors(k_neighbors)
    head_dim = C // num_heads
    scale = head_dim ** (-0.5)

    # Params cast to bf16 once (MXU operands); activations cast in-kernel.
    qkv_w = params["qkv_w"].astype(jnp.bfloat16)
    wq, wk, wv = qkv_w[:C], qkv_w[C:2 * C], qkv_w[2 * C:]
    bq = params["qkv_b"][:C]
    bk = params["qkv_b"][C:2 * C]
    bv = params["qkv_b"][2 * C:]

    q, k, v = qkv_projection(x.reshape(B * L, C), wq, wk, wv, bq, bk, bv,
                             scale=scale)
    q = q.reshape(B, L, C)   # metadata-only reshapes
    k = k.reshape(B, L, C)
    v = v.reshape(B, L, C)

    out = na_attention_proj(
        q, k, v, params["proj_w"].astype(jnp.bfloat16), params["proj_b"],
        num_heads=num_heads, head_dim=head_dim, H=Hs, W=Ws,
        kernel_size=K, row_tile=row_tile)
    # attn_drop / proj_drop have rate 0.0 (module defaults) -> no-ops
    return out


# ----------------------------- pure-JAX reference ------------------------------

def _neighborhood_bias_np(H: int, W: int, kernel_size: int) -> np.ndarray:
    K = kernel_size
    nb = K // 2

    def axis_mask(length: int) -> np.ndarray:
        idx = np.arange(length)
        start = np.clip(idx - nb, 0, length - K)
        pos = np.arange(length)
        return (pos[None, :] >= start[:, None]) & (pos[None, :] < start[:, None] + K)

    mh = axis_mask(H)
    mw = axis_mask(W)
    mask = (mh[:, None, :, None] & mw[None, :, None, :]).reshape(H * W, H * W)
    return np.where(mask, 0.0, -1e30).astype(np.float32)


def reference(x, params, num_heads: int, k_neighbors: int):
    B, L, C = x.shape
    Hs = int(round(math.sqrt(L)))
    K = kernel_size_from_neighbors(k_neighbors)
    hd = C // num_heads
    scale = hd ** (-0.5)
    qkv = x @ params["qkv_w"].T + params["qkv_b"]
    qkv = qkv.reshape(B, L, 3, num_heads, hd).transpose(2, 0, 3, 1, 4)
    q, k, v = qkv[0], qkv[1], qkv[2]
    bias = jnp.asarray(_neighborhood_bias_np(Hs, Hs, K))
    s = jnp.einsum("bhld,bhmd->bhlm", q * scale, k) + bias
    p = jax.nn.softmax(s, axis=-1)
    o = jnp.einsum("bhlm,bhmd->bhld", p, v)
    o = o.transpose(0, 2, 1, 3).reshape(B, L, C)
    return o @ params["proj_w"].T + params["proj_b"]


# ----------------------------- main -------------------------------------------

if __name__ == "__main__":
    B, Hs, Ws, C, num_heads = 2, 8, 8, 32, 4
    L = Hs * Ws
    k_neighbors = 4  # sqrt(4)=2 -> kernel_size 3

    key = jax.random.PRNGKey(0)
    kx, k1, k2, k3, k4 = jax.random.split(key, 5)
    x = jax.random.normal(kx, (B, L, C), jnp.float32)
    params = dict(
        qkv_w=jax.random.normal(k1, (3 * C, C), jnp.float32) * 0.02,
        qkv_b=jax.random.normal(k2, (3 * C,), jnp.float32) * 0.02,
        proj_w=jax.random.normal(k3, (C, C), jnp.float32) * 0.02,
        proj_b=jax.random.normal(k4, (C,), jnp.float32) * 0.02,
    )

    # row_tile=2 exercises the banded path (4 query-row tiles, band clipping at
    # both image edges); the auto heuristic would pick the full H at this toy size.
    out = neighborhood_attention_2d(x, params, num_heads, k_neighbors, row_tile=2)
    out = jax.block_until_ready(out)

    ref = jax.block_until_ready(reference(x, params, num_heads, k_neighbors))
    assert out.shape == (B, L, C)
    assert np.allclose(np.asarray(out), np.asarray(ref), atol=2e-3, rtol=1e-2), (
        float(np.max(np.abs(np.asarray(out) - np.asarray(ref)))))

    print("KERNEL_OK")
</pallas_src>

<mosaic_0001>
module attributes {stable_mosaic.version = 11 : i64} {
  func.func @_qkv_kernel(%arg0: i32, %arg1: memref<128x32xf32, #tpu.memory_space<vmem>>, %arg2: memref<32x32xbf16, #tpu.memory_space<vmem>>, %arg3: memref<32x32xbf16, #tpu.memory_space<vmem>>, %arg4: memref<32x32xbf16, #tpu.memory_space<vmem>>, %arg5: memref<1x32xf32, #tpu.memory_space<vmem>>, %arg6: memref<1x32xf32, #tpu.memory_space<vmem>>, %arg7: memref<1x32xf32, #tpu.memory_space<vmem>>, %arg8: memref<128x32xbf16, #tpu.memory_space<vmem>>, %arg9: memref<128x32xbf16, #tpu.memory_space<vmem>>, %arg10: memref<128x32xbf16, #tpu.memory_space<vmem>>) attributes {dimension_semantics = [#tpu.dimension_semantics<parallel>], iteration_bounds = array<i64: 1>, scalar_prefetch = 0 : i64, scratch_operands = 0 : i64, tpu.core_type = #tpu.core_type<tc>, window_params = [{transform_indices = @transform_0, window_bounds = array<i64: 128, 32>}, {pipeline_mode = #tpu.pipeline_mode<synchronous>, transform_indices = @transform_1, window_bounds = array<i64: 32, 32>}, {pipeline_mode = #tpu.pipeline_mode<synchronous>, transform_indices = @transform_2, window_bounds = array<i64: 32, 32>}, {pipeline_mode = #tpu.pipeline_mode<synchronous>, transform_indices = @transform_3, window_bounds = array<i64: 32, 32>}, {pipeline_mode = #tpu.pipeline_mode<synchronous>, transform_indices = @transform_4, window_bounds = array<i64: 1, 32>}, {pipeline_mode = #tpu.pipeline_mode<synchronous>, transform_indices = @transform_5, window_bounds = array<i64: 1, 32>}, {pipeline_mode = #tpu.pipeline_mode<synchronous>, transform_indices = @transform_6, window_bounds = array<i64: 1, 32>}, {transform_indices = @transform_7, window_bounds = array<i64: 128, 32>}, {transform_indices = @transform_8, window_bounds = array<i64: 128, 32>}, {transform_indices = @transform_9, window_bounds = array<i64: 128, 32>}]} {
    %c0 = arith.constant 0 : index
    %c0_0 = arith.constant 0 : index
    %0 = vector.load %arg1[%c0, %c0_0] : memref<128x32xf32, #tpu.memory_space<vmem>>, vector<128x32xf32>
    %1 = arith.truncf %0 : vector<128x32xf32> to vector<128x32xbf16>
    %c0_1 = arith.constant 0 : index
    %c0_2 = arith.constant 0 : index
    %2 = vector.load %arg2[%c0_1, %c0_2] : memref<32x32xbf16, #tpu.memory_space<vmem>>, vector<32x32xbf16>
    %cst = arith.constant dense<0.000000e+00> : vector<128x32xf32>
    %3 = tpu.matmul %1, %2, %cst {dimension_numbers = #tpu.dot_dimension_numbers<[1], [1], [0], [0], [0, 0, 1, 0], [], []>} : vector<128x32xbf16>, vector<32x32xbf16>, vector<128x32xf32> -> vector<128x32xf32>
    %c0_3 = arith.constant 0 : index
    %c0_4 = arith.constant 0 : index
    %4 = vector.load %arg5[%c0_3, %c0_4] : memref<1x32xf32, #tpu.memory_space<vmem>>, vector<1x32xf32>
    %5 = vector.broadcast %4 : vector<1x32xf32> to vector<128x32xf32>
    %6 = arith.addf %3, %5 : vector<128x32xf32>
    %cst_5 = arith.constant 0.353553385 : f32
    %7 = vector.broadcast %cst_5 : f32 to vector<128x32xf32>
    %8 = arith.mulf %6, %7 : vector<128x32xf32>
    %9 = arith.truncf %8 : vector<128x32xf32> to vector<128x32xbf16>
    %c0_6 = arith.constant 0 : index
    %c0_7 = arith.constant 0 : index
    %10 = vector.load %arg8[%c0_6, %c0_7] : memref<128x32xbf16, #tpu.memory_space<vmem>>, vector<128x32xbf16>
    tpu.vector_store %arg8[%c0_6, %c0_7], %9 {strides = array<i32>} : memref<128x32xbf16, #tpu.memory_space<vmem>>, vector<128x32xbf16>,
    %c0_8 = arith.constant 0 : index
    %c0_9 = arith.constant 0 : index
    %11 = vector.load %arg3[%c0_8, %c0_9] : memref<32x32xbf16, #tpu.memory_space<vmem>>, vector<32x32xbf16>
    %cst_10 = arith.constant dense<0.000000e+00> : vector<128x32xf32>
    %12 = tpu.matmul %1, %11, %cst_10 {dimension_numbers = #tpu.dot_dimension_numbers<[1], [1], [0], [0], [0, 0, 1, 0], [], []>} : vector<128x32xbf16>, vector<32x32xbf16>, vector<128x32xf32> -> vector<128x32xf32>
    %c0_11 = arith.constant 0 : index
    %c0_12 = arith.constant 0 : index
    %13 = vector.load %arg6[%c0_11, %c0_12] : memref<1x32xf32, #tpu.memory_space<vmem>>, vector<1x32xf32>
    %14 = vector.broadcast %13 : vector<1x32xf32> to vector<128x32xf32>
    %15 = arith.addf %12, %14 : vector<128x32xf32>
    %16 = arith.truncf %15 : vector<128x32xf32> to vector<128x32xbf16>
    %c0_13 = arith.constant 0 : index
    %c0_14 = arith.constant 0 : index
    %17 = vector.load %arg9[%c0_13, %c0_14] : memref<128x32xbf16, #tpu.memory_space<vmem>>, vector<128x32xbf16>
    tpu.vector_store %arg9[%c0_13, %c0_14], %16 {strides = array<i32>} : memref<128x32xbf16, #tpu.memory_space<vmem>>, vector<128x32xbf16>,
    %c0_15 = arith.constant 0 : index
    %c0_16 = arith.constant 0 : index
    %18 = vector.load %arg4[%c0_15, %c0_16] : memref<32x32xbf16, #tpu.memory_space<vmem>>, vector<32x32xbf16>
    %cst_17 = arith.constant dense<0.000000e+00> : vector<128x32xf32>
    %19 = tpu.matmul %1, %18, %cst_17 {dimension_numbers = #tpu.dot_dimension_numbers<[1], [1], [0], [0], [0, 0, 1, 0], [], []>} : vector<128x32xbf16>, vector<32x32xbf16>, vector<128x32xf32> -> vector<128x32xf32>
    %c0_18 = arith.constant 0 : index
    %c0_19 = arith.constant 0 : index
    %20 = vector.load %arg7[%c0_18, %c0_19] : memref<1x32xf32, #tpu.memory_space<vmem>>, vector<1x32xf32>
    %21 = vector.broadcast %20 : vector<1x32xf32> to vector<128x32xf32>
    %22 = arith.addf %19, %21 : vector<128x32xf32>
    %23 = arith.truncf %22 : vector<128x32xf32> to vector<128x32xbf16>
    %c0_20 = arith.constant 0 : index
    %c0_21 = arith.constant 0 : index
    %24 = vector.load %arg10[%c0_20, %c0_21] : memref<128x32xbf16, #tpu.memory_space<vmem>>, vector<128x32xbf16>
    tpu.vector_store %arg10[%c0_20, %c0_21], %23 {strides = array<i32>} : memref<128x32xbf16, #tpu.memory_space<vmem>>, vector<128x32xbf16>,
    return
  }
  func.func @transform_0(%arg0: i32) -> (i32, i32) {
    %c0_i32 = arith.constant 0 : i32
    %c0_i32_0 = arith.constant 0 : i32
    return %arg0, %c0_i32 : i32, i32
  }
  func.func @transform_1(%arg0: i32) -> (i32, i32) {
    %c0_i32 = arith.constant 0 : i32
    %c0_i32_0 = arith.constant 0 : i32
    %c0_i32_1 = arith.constant 0 : i32
    return %c0_i32, %c0_i32_0 : i32, i32
  }
  func.func @transform_2(%arg0: i32) -> (i32, i32) {
    %c0_i32 = arith.constant 0 : i32
    %c0_i32_0 = arith.constant 0 : i32
    %c0_i32_1 = arith.constant 0 : i32
    return %c0_i32, %c0_i32_0 : i32, i32
  }
  func.func @transform_3(%arg0: i32) -> (i32, i32) {
    %c0_i32 = arith.constant 0 : i32
    %c0_i32_0 = arith.constant 0 : i32
    %c0_i32_1 = arith.constant 0 : i32
    return %c0_i32, %c0_i32_0 : i32, i32
  }
  func.func @transform_4(%arg0: i32) -> (i32, i32) {
    %c0_i32 = arith.constant 0 : i32
    %c0_i32_0 = arith.constant 0 : i32
    %c0_i32_1 = arith.constant 0 : i32
    return %c0_i32, %c0_i32_0 : i32, i32
  }
  func.func @transform_5(%arg0: i32) -> (i32, i32) {
    %c0_i32 = arith.constant 0 : i32
    %c0_i32_0 = arith.constant 0 : i32
    %c0_i32_1 = arith.constant 0 : i32
    return %c0_i32, %c0_i32_0 : i32, i32
  }
  func.func @transform_6(%arg0: i32) -> (i32, i32) {
    %c0_i32 = arith.constant 0 : i32
    %c0_i32_0 = arith.constant 0 : i32
    %c0_i32_1 = arith.constant 0 : i32
    return %c0_i32, %c0_i32_0 : i32, i32
  }
  func.func @transform_7(%arg0: i32) -> (i32, i32) {
    %c0_i32 = arith.constant 0 : i32
    %c0_i32_0 = arith.constant 0 : i32
    return %arg0, %c0_i32 : i32, i32
  }
  func.func @transform_8(%arg0: i32) -> (i32, i32) {
    %c0_i32 = arith.constant 0 : i32
    %c0_i32_0 = arith.constant 0 : i32
    return %arg0, %c0_i32 : i32, i32
  }
  func.func @transform_9(%arg0: i32) -> (i32, i32) {
    %c0_i32 = arith.constant 0 : i32
    %c0_i32_0 = arith.constant 0 : i32
    return %arg0, %c0_i32 : i32, i32
  }
}

</mosaic_0001>

<bundles_post_ra>
// kernel: tpu_custom_call.1
= control target key start
LH: loop header
LB: loop body
LE: loop exit
PB: predicated region body
PF: predicated region fallthrough
CT: control target
= control target key end

     0   :  { %vm75_vm0 = vcmask 261120   ;;  %vm283_vm1 = vcmask 257024   ;;  %s1366_s1 = inlined_call_operand.vmem [shape: bf16[32,32], index: 1, kind: input, shape index: {}]   ;;  %s1367_s0 = inlined_call_operand.vmem [shape: f32[128,32], index: 0, kind: input, shape index: {}]   ;;  %s1368_s2 = inlined_call_operand.vmem [shape: bf16[32,32], index: 2, kind: input, shape index: {}]   ;;  %s1369_s3 = inlined_call_operand.vmem [shape: bf16[32,32], index: 3, kind: input, shape index: {}]   ;;  %s1370_s4 = inlined_call_operand.vmem [shape: f32[1,32], index: 4, kind: input, shape index: {}]   ;;  %s1371_s7 = inlined_call_operand.vmem [shape: bf16[128,32], index: 7, kind: output, shape index: {0}]   ;;  %s1372_s5 = inlined_call_operand.vmem [shape: f32[1,32], index: 5, kind: input, shape index: {}]   ;;  %s1373_s6 = inlined_call_operand.vmem [shape: f32[1,32], index: 6, kind: input, shape index: {}]   ;;  %s1374_s8 = inlined_call_operand.vmem [shape: bf16[128,32], index: 8, kind: output, shape index: {1}]   ;;  %s1375_s9 = inlined_call_operand.vmem [shape: bf16[128,32], index: 9, kind: output, shape index: {2}]  }
   0x1   :  { %v951_v0 = vld [vmem:[%s1366_s1 + $0x8] sm:$0xff]   ;;  %v952_v1 = vld [vmem:[%s1366_s1] sm:$0xff]   ;;  %v32_v12 = vld [vmem:[%s1367_s0 + $0x10] sm:$0xff] }
   0x2   :  { %943 = vmatprep.subr.msk.bf16.mxu0 %vm75_vm0, %v951_v0  ;;  %944 = vmatprep.subr.msk.bf16.mxu1 %vm75_vm0, %v951_v0  ;;  %v104_v2 = vsel %vm75_vm0, %v951_v0, 0  ;;  %v30_v3 = vld [vmem:[%s1367_s0] sm:$0xff]  ;;  %v31_v4 = vld [vmem:[%s1367_s0 + $0x8] sm:$0xff]  ;;  %v101_v9 = vsel %vm75_vm0, %v952_v1, 0  ;;  %v33_v13 = vld [vmem:[%s1367_s0 + $0x18] sm:$0xff] }
   0x3   :  { %v38_v5 = vld [vmem:[%s1367_s0 + $0x40] sm:$0xff]  ;;  %880 = vmatpush3.bf16.xpose.msra.mxu0 %v104_v2  ;;  %941 = vmatpush3.bf16.xpose.msra.mxu1 %v104_v2  ;;  %v46_v6 = vpack.c.bf16 %v31_v4, %v30_v3  ;;  %v39_v7 = vld [vmem:[%s1367_s0 + $0x48] sm:$0xff]  ;;  %v40_v14 = vld [vmem:[%s1367_s0 + $0x50] sm:$0xff]  ;;  %v47_v20 = vpack.c.bf16 %v33_v13, %v32_v12 }
   0x4   :  { %945 = vmatprep.subr.msk.bf16.mxu0 %vm75_vm0, %v952_v1  ;;  %946 = vmatprep.subr.msk.bf16.mxu1 %vm75_vm0, %v952_v1  ;;  %v50_v8 = vpack.c.bf16 %v39_v7, %v38_v5  ;;  %v953_v10 = vld [vmem:[%s1368_s2 + $0x8] sm:$0xff]   ;;  %v41_v15 = vld [vmem:[%s1367_s0 + $0x58] sm:$0xff]  ;;  %v34_v16 = vld [vmem:[%s1367_s0 + $0x20] sm:$0xff] }
   0x5   :  { %883 = vmatprep.mubr.msk.bf16.mxu0 %vm75_vm0, %v46_v6  ;;  %v954_v11 = vld [vmem:[%s1369_s3 + $0x8] sm:$0xff]   ;;  %v42_v18 = vld [vmem:[%s1367_s0 + $0x60] sm:$0xff]  ;;  %v51_v21 = vpack.c.bf16 %v41_v15, %v40_v14  ;;  %v325_v22 = vsel %vm75_vm0, %v953_v10, 0  ;;  %v36_v28 = vld [vmem:[%s1367_s0 + $0x30] sm:$0xff] }
   0x6   :  { %891 = vmatprep.mubr.msk.bf16.mxu1 %vm75_vm0, %v50_v8  ;;  %v35_v17 = vld [vmem:[%s1367_s0 + $0x28] sm:$0xff]  ;;  %v529_v23 = vsel %vm75_vm0, %v954_v11, 0  ;;  %v955_v26 = vld [vmem:[%s1368_s2] sm:$0xff]   ;;  %v37_v29 = vld [vmem:[%s1367_s0 + $0x38] sm:$0xff] }
   0x7   :  { %v43_v19 = vld [vmem:[%s1367_s0 + $0x68] sm:$0xff]  ;;  %v48_v24 = vpack.c.bf16 %v35_v17, %v34_v16  ;;  %v956_v27 = vld [vmem:[%s1369_s3] sm:$0xff]   ;;  %v44_v30 = vld [vmem:[%s1367_s0 + $0x70] sm:$0xff]  ;;  %v49_v32 = vpack.c.bf16 %v37_v29, %v36_v28  ;;  %v322_v34 = vsel %vm75_vm0, %v955_v26, 0 }
   0x8   :  { %v52_v25 = vpack.c.bf16 %v43_v19, %v42_v18  ;;  %v45_v31 = vld [vmem:[%s1367_s0 + $0x78] sm:$0xff]  ;;  %v526_v35 = vsel %vm75_vm0, %v956_v27, 0  ;;  %v1114_v36 = vld [vmem:[%s1370_s4] ss:$0 sm:$0xff] }
   0x9   :  { %v53_v33 = vpack.c.bf16 %v45_v31, %v44_v30  ;;  %v1180_v30 = vld [vmem:[%s1373_s6] ss:$0 sm:$0xff] }
   0xb   :  { %882 = vmatpush3.bf16.xpose.msra.mxu0 %v101_v9  ;;  %942 = vmatpush3.bf16.xpose.msra.mxu1 %v101_v9 }
   0xc   :  { %947 = vmatprep.subr.msk.bf16.mxu1 %vm75_vm0, %v953_v10  ;;  %949 = vmatprep.subr.msk.bf16.mxu0 %vm75_vm0, %v954_v11 }
  0x12   :  { %884 = vmatmul.mubr.msk.bf16.vlgmr.msra.gmra.mxu0 %vm75_vm0, %v47_v20  ;;  %892 = vmatmul.mubr.msk.bf16.vlgmr.msra.gmra.mxu1 %vm75_vm0, %v51_v21 }
  0x13   :  { %900 = vmatpush3.bf16.xpose.msra.mxu1 %v325_v22  ;;  %920 = vmatpush3.bf16.xpose.msra.mxu0 %v529_v23 }
  0x14   :  { %887 = vmatprep.mubr.msk.bf16.mxu0 %vm75_vm0, %v48_v24  ;;  %895 = vmatprep.mubr.msk.bf16.mxu1 %vm75_vm0, %v52_v25 }
  0x15   :  { %948 = vmatprep.subr.msk.bf16.mxu1 %vm75_vm0, %v955_v26  ;;  %950 = vmatprep.subr.msk.bf16.mxu0 %vm75_vm0, %v956_v27 }
  0x1a   :  { %888 = vmatmul.mubr.msk.bf16.gmra.mxu0 %vm75_vm0, %v49_v32  ;;  %896 = vmatmul.mubr.msk.bf16.gmra.mxu1 %vm75_vm0, %v53_v33 }
  0x1b   :  { %902 = vmatpush3.bf16.xpose.msra.mxu1 %v322_v34  ;;  %922 = vmatpush3.bf16.xpose.msra.mxu0 %v526_v35 }
  0x1c   :  { %903 = vmatprep.mubr.msk.bf16.mxu1 %vm75_vm0, %v46_v6  ;;  %923 = vmatprep.mubr.msk.bf16.mxu0 %vm75_vm0, %v46_v6 }
  0x22   :  { %904 = vmatmul.mubr.msk.bf16.vlgmr.msra.gmra.mxu1 %vm75_vm0, %v47_v20  ;;  %924 = vmatmul.mubr.msk.bf16.vlgmr.msra.gmra.mxu0 %vm75_vm0, %v47_v20 }
  0x23   :  { %907 = vmatprep.mubr.msk.bf16.mxu1 %vm75_vm0, %v48_v24  ;;  %927 = vmatprep.mubr.msk.bf16.mxu0 %vm75_vm0, %v48_v24 }
  0x2a   :  { %908 = vmatmul.mubr.msk.bf16.gmra.mxu1 %vm75_vm0, %v49_v32  ;;  %928 = vmatmul.mubr.msk.bf16.gmra.mxu0 %vm75_vm0, %v49_v32 }
  0x2b   :  { %911 = vmatprep.mubr.msk.bf16.mxu1 %vm75_vm0, %v50_v8  ;;  %931 = vmatprep.mubr.msk.bf16.mxu0 %vm75_vm0, %v50_v8 }
  0x32   :  { %912 = vmatmul.mubr.msk.bf16.gmra.mxu1 %vm75_vm0, %v51_v21  ;;  %932 = vmatmul.mubr.msk.bf16.gmra.mxu0 %vm75_vm0, %v51_v21 }
  0x33   :  { %915 = vmatprep.mubr.msk.bf16.mxu1 %vm75_vm0, %v52_v25  ;;  %935 = vmatprep.mubr.msk.bf16.mxu0 %vm75_vm0, %v52_v25  ;;  %v1165_v25 = vld [vmem:[%s1372_s5] ss:$0 sm:$0xff] }
  0x3a   :  { %916 = vmatmul.mubr.msk.bf16.gmra.mxu1 %vm75_vm0, %v53_v33  ;;  %936 = vmatmul.mubr.msk.bf16.gmra.mxu0 %vm75_vm0, %v53_v33 }
  0xd2   :  { %v885_v37 = vpop.f32.mrf.mxu0  ;;  %v893_v38 = vpop.f32.mrf.mxu1 }
  0xd3   :  { %v149_v39 = vadd.f32 %v885_v37, %v1114_v36  ;;  %v181_v40 = vadd.f32 %v893_v38, %v1114_v36 }
  0xd4   :  { %v140_v41 = vpop.f32.mrf.mxu0  ;;  %v172_v42 = vpop.f32.mrf.mxu1 }
  0xd5   :  { %v205_v43 = vmul.f32 0.35355338, %v149_v39  ;;  %v213_v44 = vmul.f32 0.35355338, %v181_v40  ;;  %v141_v45 = vadd.f32 %v1114_v36, %v140_v41  ;;  %v173_v46 = vadd.f32 %v1114_v36, %v172_v42 }
  0xd6   :  { %v886_v47 = vpop.f32.mrf.mxu0  ;;  %v894_v48 = vpop.f32.mrf.mxu1 }
  0xd7   :  { %v803_v49 = vpack.c.bf16 %v205_v43, %v205_v43  ;;  %v811_v50 = vpack.c.bf16 %v213_v44, %v213_v44  ;;  %v203_v51 = vmul.f32 0.35355338, %v141_v45  ;;  %v211_v52 = vmul.f32 0.35355338, %v173_v46 }
  0xd8   :  { %v152_v53 = vadd.f32 %v886_v47, %v1114_v36  ;;  %v184_v54 = vadd.f32 %v894_v48, %v1114_v36  ;;  %v143_v55 = vpop.f32.mrf.mxu0  ;;  %v175_v56 = vpop.f32.mrf.mxu1 }
  0xd9   :  { %286 = vst.msk [vmem:[%s1371_s7 + $0x8] sm:$0xf] %vm283_vm1, %v803_v49  ;;  %294 = vst.msk [vmem:[%s1371_s7 + $0x28] sm:$0xf] %vm283_vm1, %v811_v50  ;;  %v801_v57 = vpack.c.bf16 %v203_v51, %v203_v51  ;;  %v809_v58 = vpack.c.bf16 %v211_v52, %v211_v52  ;;  %v144_v59 = vadd.f32 %v1114_v36, %v143_v55 }
  0xda   :  { %v176_v60 = vadd.f32 %v1114_v36, %v175_v56  ;;  %v206_v61 = vmul.f32 0.35355338, %v152_v53  ;;  %v214_v62 = vmul.f32 0.35355338, %v184_v54  ;;  %v889_v63 = vpop.f32.mrf.mxu0  ;;  %v897_v0 = vpop.f32.mrf.mxu1 }
  0xdb   :  { %284 = vst.msk [vmem:[%s1371_s7] sm:$0xf] %vm283_vm1, %v801_v57  ;;  %292 = vst.msk [vmem:[%s1371_s7 + $0x20] sm:$0xf] %vm283_vm1, %v809_v58  ;;  %v204_v1 = vmul.f32 0.35355338, %v144_v59  ;;  %v165_v3 = vadd.f32 %v889_v63, %v1114_v36  ;;  %v197_v4 = vadd.f32 %v897_v0, %v1114_v36 }
  0xdc   :  { %v212_v2 = vmul.f32 0.35355338, %v176_v60  ;;  %v804_v5 = vpack.c.bf16 %v206_v61, %v206_v61  ;;  %v812_v6 = vpack.c.bf16 %v214_v62, %v214_v62  ;;  %v156_v7 = vpop.f32.mrf.mxu0  ;;  %v188_v8 = vpop.f32.mrf.mxu1 }
  0xdd   :  { %v802_v9 = vpack.c.bf16 %v204_v1, %v204_v1  ;;  %v209_v11 = vmul.f32 0.35355338, %v165_v3  ;;  %v217_v12 = vmul.f32 0.35355338, %v197_v4  ;;  %v157_v13 = vadd.f32 %v1114_v36, %v156_v7 }
  0xde   :  { %v810_v10 = vpack.c.bf16 %v212_v2, %v212_v2  ;;  %287 = vst.msk [vmem:[%s1371_s7 + $0xc] sm:$0xf] %vm283_vm1, %v804_v5  ;;  %295 = vst.msk [vmem:[%s1371_s7 + $0x2c] sm:$0xf] %vm283_vm1, %v812_v6  ;;  %v189_v14 = vadd.f32 %v1114_v36, %v188_v8  ;;  %v890_v15 = vpop.f32.mrf.mxu0  ;;  %v898_v16 = vpop.f32.mrf.mxu1 }
  0xdf   :  { %285 = vst.msk [vmem:[%s1371_s7 + $0x4] sm:$0xf] %vm283_vm1, %v802_v9  ;;  %v807_v17 = vpack.c.bf16 %v209_v11, %v209_v11  ;;  %v815_v18 = vpack.c.bf16 %v217_v12, %v217_v12  ;;  %v168_v19 = vadd.f32 %v890_v15, %v1114_v36  ;;  %v200_v20 = vadd.f32 %v898_v16, %v1114_v36 }
  0xe0   :  { %293 = vst.msk [vmem:[%s1371_s7 + $0x24] sm:$0xf] %vm283_vm1, %v810_v10  ;;  %v207_v21 = vmul.f32 0.35355338, %v157_v13  ;;  %v215_v22 = vmul.f32 0.35355338, %v189_v14  ;;  %v159_v23 = vpop.f32.mrf.mxu0  ;;  %v191_v24 = vpop.f32.mrf.mxu1 }
  0xe1   :  { %290 = vst.msk [vmem:[%s1371_s7 + $0x18] sm:$0xf] %vm283_vm1, %v807_v17  ;;  %298 = vst.msk [vmem:[%s1371_s7 + $0x38] sm:$0xf] %vm283_vm1, %v815_v18  ;;  %v210_v26 = vmul.f32 0.35355338, %v168_v19  ;;  %v160_v28 = vadd.f32 %v1114_v36, %v159_v23  ;;  %v192_v29 = vadd.f32 %v1114_v36, %v191_v24 }
  0xe2   :  { %v218_v27 = vmul.f32 0.35355338, %v200_v20  ;;  %v805_v31 = vpack.c.bf16 %v207_v21, %v207_v21  ;;  %v813_v32 = vpack.c.bf16 %v215_v22, %v215_v22  ;;  %v905_v33 = vpop.f32.mrf.mxu1  ;;  %v925_v34 = vpop.f32.mrf.mxu0 }
  0xe3   :  { %v808_v35 = vpack.c.bf16 %v210_v26, %v210_v26  ;;  %v208_v38 = vmul.f32 0.35355338, %v160_v28  ;;  %v216_v39 = vmul.f32 0.35355338, %v192_v29  ;;  %v370_v36 = vadd.f32 %v905_v33, %v1165_v25 }
  0xe4   :  { %v816_v37 = vpack.c.bf16 %v218_v27, %v218_v27  ;;  %288 = vst.msk [vmem:[%s1371_s7 + $0x10] sm:$0xf] %vm283_vm1, %v805_v31  ;;  %296 = vst.msk [vmem:[%s1371_s7 + $0x30] sm:$0xf] %vm283_vm1, %v813_v32  ;;  %v574_v40 = vadd.f32 %v925_v34, %v1180_v30  ;;  %v361_v41 = vpop.f32.mrf.mxu1  ;;  %v565_v42 = vpop.f32.mrf.mxu0 }
  0xe5   :  { %291 = vst.msk [vmem:[%s1371_s7 + $0x1c] sm:$0xf] %vm283_vm1, %v808_v35  ;;  %v806_v43 = vpack.c.bf16 %v208_v38, %v208_v38  ;;  %v814_v44 = vpack.c.bf16 %v216_v39, %v216_v39  ;;  %v362_v45 = vadd.f32 %v1165_v25, %v361_v41  ;;  %v566_v46 = vadd.f32 %v1180_v30, %v565_v42 }
  0xe6   :  { %299 = vst.msk [vmem:[%s1371_s7 + $0x3c] sm:$0xf] %vm283_vm1, %v816_v37  ;;  %v819_v47 = vpack.c.bf16 %v370_v36, %v370_v36  ;;  %v835_v48 = vpack.c.bf16 %v574_v40, %v574_v40  ;;  %v906_v49 = vpop.f32.mrf.mxu1  ;;  %v926_v50 = vpop.f32.mrf.mxu0 }
  0xe7   :  { %289 = vst.msk [vmem:[%s1371_s7 + $0x14] sm:$0xf] %vm283_vm1, %v806_v43  ;;  %297 = vst.msk [vmem:[%s1371_s7 + $0x34] sm:$0xf] %vm283_vm1, %v814_v44  ;;  %v817_v51 = vpack.c.bf16 %v362_v45, %v362_v45  ;;  %v833_v52 = vpack.c.bf16 %v566_v46, %v566_v46  ;;  %v373_v53 = vadd.f32 %v906_v49, %v1165_v25 }
  0xe8   :  { %v577_v54 = vadd.f32 %v926_v50, %v1180_v30  ;;  %490 = vst.msk [vmem:[%s1374_s8 + $0x8] sm:$0xf] %vm283_vm1, %v819_v47  ;;  %694 = vst.msk [vmem:[%s1375_s9 + $0x8] sm:$0xf] %vm283_vm1, %v835_v48  ;;  %v364_v55 = vpop.f32.mrf.mxu1  ;;  %v568_v56 = vpop.f32.mrf.mxu0 }
  0xe9   :  { %488 = vst.msk [vmem:[%s1374_s8] sm:$0xf] %vm283_vm1, %v817_v51  ;;  %692 = vst.msk [vmem:[%s1375_s9] sm:$0xf] %vm283_vm1, %v833_v52  ;;  %v820_v57 = vpack.c.bf16 %v373_v53, %v373_v53  ;;  %v365_v59 = vadd.f32 %v1165_v25, %v364_v55  ;;  %v569_v60 = vadd.f32 %v1180_v30, %v568_v56 }
  0xea   :  { %v836_v58 = vpack.c.bf16 %v577_v54, %v577_v54  ;;  %v909_v61 = vpop.f32.mrf.mxu1  ;;  %v929_v62 = vpop.f32.mrf.mxu0 }
  0xeb   :  { %491 = vst.msk [vmem:[%s1374_s8 + $0xc] sm:$0xf] %vm283_vm1, %v820_v57  ;;  %v818_v63 = vpack.c.bf16 %v365_v59, %v365_v59  ;;  %v834_v0 = vpack.c.bf16 %v569_v60, %v569_v60  ;;  %v386_v1 = vadd.f32 %v909_v61, %v1165_v25  ;;  %v590_v2 = vadd.f32 %v929_v62, %v1180_v30 }
  0xec   :  { %695 = vst.msk [vmem:[%s1375_s9 + $0xc] sm:$0xf] %vm283_vm1, %v836_v58  ;;  %v377_v3 = vpop.f32.mrf.mxu1  ;;  %v581_v4 = vpop.f32.mrf.mxu0 }
  0xed   :  { %489 = vst.msk [vmem:[%s1374_s8 + $0x4] sm:$0xf] %vm283_vm1, %v818_v63  ;;  %693 = vst.msk [vmem:[%s1375_s9 + $0x4] sm:$0xf] %vm283_vm1, %v834_v0  ;;  %v823_v5 = vpack.c.bf16 %v386_v1, %v386_v1  ;;  %v839_v6 = vpack.c.bf16 %v590_v2, %v590_v2  ;;  %v378_v7 = vadd.f32 %v1165_v25, %v377_v3 }
  0xee   :  { %v582_v8 = vadd.f32 %v1180_v30, %v581_v4  ;;  %v910_v9 = vpop.f32.mrf.mxu1  ;;  %v930_v10 = vpop.f32.mrf.mxu0 }
  0xef   :  { %494 = vst.msk [vmem:[%s1374_s8 + $0x18] sm:$0xf] %vm283_vm1, %v823_v5  ;;  %698 = vst.msk [vmem:[%s1375_s9 + $0x18] sm:$0xf] %vm283_vm1, %v839_v6  ;;  %v821_v11 = vpack.c.bf16 %v378_v7, %v378_v7  ;;  %v389_v13 = vadd.f32 %v910_v9, %v1165_v25  ;;  %v593_v14 = vadd.f32 %v930_v10, %v1180_v30 }
  0xf0   :  { %v837_v12 = vpack.c.bf16 %v582_v8, %v582_v8  ;;  %v380_v15 = vpop.f32.mrf.mxu1  ;;  %v584_v16 = vpop.f32.mrf.mxu0 }
  0xf1   :  { %492 = vst.msk [vmem:[%s1374_s8 + $0x10] sm:$0xf] %vm283_vm1, %v821_v11  ;;  %v824_v17 = vpack.c.bf16 %v389_v13, %v389_v13  ;;  %v840_v18 = vpack.c.bf16 %v593_v14, %v593_v14  ;;  %v381_v19 = vadd.f32 %v1165_v25, %v380_v15  ;;  %v585_v20 = vadd.f32 %v1180_v30, %v584_v16 }
  0xf2   :  { %696 = vst.msk [vmem:[%s1375_s9 + $0x10] sm:$0xf] %vm283_vm1, %v837_v12  ;;  %v913_v21 = vpop.f32.mrf.mxu1  ;;  %v933_v22 = vpop.f32.mrf.mxu0 }
  0xf3   :  { %495 = vst.msk [vmem:[%s1374_s8 + $0x1c] sm:$0xf] %vm283_vm1, %v824_v17  ;;  %699 = vst.msk [vmem:[%s1375_s9 + $0x1c] sm:$0xf] %vm283_vm1, %v840_v18  ;;  %v822_v23 = vpack.c.bf16 %v381_v19, %v381_v19  ;;  %v838_v24 = vpack.c.bf16 %v585_v20, %v585_v20  ;;  %v402_v26 = vadd.f32 %v913_v21, %v1165_v25 }
  0xf4   :  { %v606_v27 = vadd.f32 %v933_v22, %v1180_v30  ;;  %v393_v28 = vpop.f32.mrf.mxu1  ;;  %v597_v29 = vpop.f32.mrf.mxu0 }
  0xf5   :  { %493 = vst.msk [vmem:[%s1374_s8 + $0x14] sm:$0xf] %vm283_vm1, %v822_v23  ;;  %697 = vst.msk [vmem:[%s1375_s9 + $0x14] sm:$0xf] %vm283_vm1, %v838_v24  ;;  %v827_v31 = vpack.c.bf16 %v402_v26, %v402_v26  ;;  %v394_v33 = vadd.f32 %v1165_v25, %v393_v28  ;;  %v598_v34 = vadd.f32 %v1180_v30, %v597_v29 }
  0xf6   :  { %v843_v32 = vpack.c.bf16 %v606_v27, %v606_v27  ;;  %v914_v35 = vpop.f32.mrf.mxu1  ;;  %v934_v37 = vpop.f32.mrf.mxu0 }
  0xf7   :  { %498 = vst.msk [vmem:[%s1374_s8 + $0x28] sm:$0xf] %vm283_vm1, %v827_v31  ;;  %v825_v38 = vpack.c.bf16 %v394_v33, %v394_v33  ;;  %v841_v39 = vpack.c.bf16 %v598_v34, %v598_v34  ;;  %v405_v36 = vadd.f32 %v914_v35, %v1165_v25  ;;  %v609_v40 = vadd.f32 %v934_v37, %v1180_v30 }
  0xf8   :  { %702 = vst.msk [vmem:[%s1375_s9 + $0x28] sm:$0xf] %vm283_vm1, %v843_v32  ;;  %v396_v41 = vpop.f32.mrf.mxu1  ;;  %v600_v42 = vpop.f32.mrf.mxu0 }
  0xf9   :  { %496 = vst.msk [vmem:[%s1374_s8 + $0x20] sm:$0xf] %vm283_vm1, %v825_v38  ;;  %700 = vst.msk [vmem:[%s1375_s9 + $0x20] sm:$0xf] %vm283_vm1, %v841_v39  ;;  %v828_v43 = vpack.c.bf16 %v405_v36, %v405_v36  ;;  %v844_v44 = vpack.c.bf16 %v609_v40, %v609_v40  ;;  %v397_v45 = vadd.f32 %v1165_v25, %v396_v41 }
  0xfa   :  { %v601_v46 = vadd.f32 %v1180_v30, %v600_v42  ;;  %v917_v47 = vpop.f32.mrf.mxu1  ;;  %v937_v48 = vpop.f32.mrf.mxu0 }
  0xfb   :  { %499 = vst.msk [vmem:[%s1374_s8 + $0x2c] sm:$0xf] %vm283_vm1, %v828_v43  ;;  %703 = vst.msk [vmem:[%s1375_s9 + $0x2c] sm:$0xf] %vm283_vm1, %v844_v44  ;;  %v826_v49 = vpack.c.bf16 %v397_v45, %v397_v45  ;;  %v418_v51 = vadd.f32 %v917_v47, %v1165_v25  ;;  %v622_v52 = vadd.f32 %v937_v48, %v1180_v30 }
  0xfc   :  { %v842_v50 = vpack.c.bf16 %v601_v46, %v601_v46  ;;  %v409_v53 = vpop.f32.mrf.mxu1  ;;  %v613_v54 = vpop.f32.mrf.mxu0 }
  0xfd   :  { %497 = vst.msk [vmem:[%s1374_s8 + $0x24] sm:$0xf] %vm283_vm1, %v826_v49  ;;  %v831_v55 = vpack.c.bf16 %v418_v51, %v418_v51  ;;  %v847_v56 = vpack.c.bf16 %v622_v52, %v622_v52  ;;  %v410_v57 = vadd.f32 %v1165_v25, %v409_v53  ;;  %v614_v58 = vadd.f32 %v1180_v30, %v613_v54 }
  0xfe   :  { %701 = vst.msk [vmem:[%s1375_s9 + $0x24] sm:$0xf] %vm283_vm1, %v842_v50  ;;  %v918_v59 = vpop.f32.mrf.mxu1  ;;  %v938_v60 = vpop.f32.mrf.mxu0 }
  0xff   :  { %502 = vst.msk [vmem:[%s1374_s8 + $0x38] sm:$0xf] %vm283_vm1, %v831_v55  ;;  %706 = vst.msk [vmem:[%s1375_s9 + $0x38] sm:$0xf] %vm283_vm1, %v847_v56  ;;  %v829_v61 = vpack.c.bf16 %v410_v57, %v410_v57  ;;  %v845_v62 = vpack.c.bf16 %v614_v58, %v614_v58  ;;  %v421_v63 = vadd.f32 %v918_v59, %v1165_v25 }
 0x100   :  { %v625_v0 = vadd.f32 %v938_v60, %v1180_v30  ;;  %v412_v1 = vpop.f32.mrf.mxu1  ;;  %v616_v2 = vpop.f32.mrf.mxu0 }
 0x101   :  { %500 = vst.msk [vmem:[%s1374_s8 + $0x30] sm:$0xf] %vm283_vm1, %v829_v61  ;;  %704 = vst.msk [vmem:[%s1375_s9 + $0x30] sm:$0xf] %vm283_vm1, %v845_v62  ;;  %v832_v3 = vpack.c.bf16 %v421_v63, %v421_v63  ;;  %v413_v5 = vadd.f32 %v1165_v25, %v412_v1  ;;  %v617_v6 = vadd.f32 %v1180_v30, %v616_v2 }
 0x102   :  { %v848_v4 = vpack.c.bf16 %v625_v0, %v625_v0 }
 0x103   :  { %503 = vst.msk [vmem:[%s1374_s8 + $0x3c] sm:$0xf] %vm283_vm1, %v832_v3  ;;  %v830_v7 = vpack.c.bf16 %v413_v5, %v413_v5  ;;  %v846_v8 = vpack.c.bf16 %v617_v6, %v617_v6 }
 0x104   :  { %707 = vst.msk [vmem:[%s1375_s9 + $0x3c] sm:$0xf] %vm283_vm1, %v848_v4 }
 0x105   :  { %501 = vst.msk [vmem:[%s1374_s8 + $0x34] sm:$0xf] %vm283_vm1, %v830_v7  ;;  %705 = vst.msk [vmem:[%s1375_s9 + $0x34] sm:$0xf] %vm283_vm1, %v846_v8 }

</bundles_post_ra>
